<compile_context>
chip_gen: v7x
topology: tpu7x:2x2x1
jax: 0.10.0
libtpu: 0.0.40
codegen_flags: <defaults>
</compile_context>

<pallas_src>
import jax
import jax.numpy as jnp
from jax.experimental import pallas as pl
from jax.experimental.pallas import tpu as pltpu


# ----------------------------------------------------------------------------
# helpers
# ----------------------------------------------------------------------------
def _ru(x, m):
    return ((x + m - 1) // m) * m


def _leaky_relu(x, slope=0.2):
    return jnp.where(x > 0, x, slope * x)


def _pick_tile(B, cap=2048):
    """Batch tile and grid size.

    B <= 256: one tile of exactly B rows (block dims == full array dims).
    B  > 256: tile ~= ceil(B/2) rounded up to 128 (>= 2 parallel grid steps for
              v7x megacore), capped at 2048 rows so the double-buffered working
              set stays far under every generation's scoped-VMEM default.
    """
    if B <= 256:
        return B, 1
    tm = min(cap, _ru((B + 1) // 2, 128))
    return tm, pl.cdiv(B, tm)


# ----------------------------------------------------------------------------
# Fused MLP kernel: the full SugiyamaNet forward for one batch tile.
# ----------------------------------------------------------------------------
def _sugiyama_kernel(x_ref, w1_ref, b1_ref, w2_ref, b2_ref, w3t_ref, b3_ref,
                     out_ref, z_ref):
    x = x_ref[...]

    # fc1 + LeakyReLU(0.2)   (Dropout2d is identity at inference)
    h1 = jnp.dot(x, w1_ref[...], preferred_element_type=jnp.float32) + b1_ref[...]
    h1 = _leaky_relu(h1)

    # fc2 + LeakyReLU(0.2)  -> latent z
    h2 = jnp.dot(h1, w2_ref[...], preferred_element_type=jnp.float32) + b2_ref[...]
    h2 = _leaky_relu(h2)
    z_ref[...] = h2.astype(z_ref.dtype)

    # fc_out (256 -> 1) as VPU multiply + lane reduction, then clamp + softplus.
    logit = jnp.sum(h2 * w3t_ref[...], axis=-1, keepdims=True) + b3_ref[...]
    logit = jnp.clip(logit, -50.0, 50.0)
    sp = jnp.maximum(logit, 0.0) + jnp.log1p(jnp.exp(-jnp.abs(logit)))
    out_ref[...] = sp.astype(out_ref.dtype)


# ----------------------------------------------------------------------------
# One-time parameter preparation (hoisted out of the per-call forward).
# ----------------------------------------------------------------------------
def prepare_params(params):
    return (
        params["w1"],                    # (size, 2*size)
        params["b1"].reshape(1, -1),     # (1, 2*size)
        params["w2"],                    # (2*size, 256)
        params["b2"].reshape(1, -1),     # (1, 256)
        params["w3"].reshape(1, -1),     # (256,1) column -> (1,256) row (== w3.T)
        params["b3"].reshape(1, 1),      # (1, 1)
    )


# ----------------------------------------------------------------------------
# Wrapper: one pallas_call, zero host-side pad/slice glue.
# ----------------------------------------------------------------------------
def sugiyama_forward(x, prepared, *, z_dtype=None):
    """Returns (out [B,1], z [B,256]) matching SugiyamaNet.forward / get_latent."""
    w1, b1, w2, b2, w3t, b3 = prepared
    B, size = x.shape
    H1 = w1.shape[1]
    H2 = w2.shape[1]
    if z_dtype is None:
        z_dtype = x.dtype  # set to jnp.bfloat16 to halve the dominant writeback

    tm, steps = _pick_tile(B)

    out, z = pl.pallas_call(
        _sugiyama_kernel,
        out_shape=(
            jax.ShapeDtypeStruct((B, 1), x.dtype),    # softplus output (dense column)
            jax.ShapeDtypeStruct((B, H2), z_dtype),   # latent z (lane-dense, 256 wide)
        ),
        grid_spec=pltpu.PrefetchScalarGridSpec(
            num_scalar_prefetch=0,
            grid=(steps,),
            in_specs=[
                pl.BlockSpec((tm, size), lambda i: (i, 0)),   # x tile (real width, no K-pad)
                pl.BlockSpec((size, H1), lambda i: (0, 0)),   # W1 (VMEM-resident)
                pl.BlockSpec((1, H1), lambda i: (0, 0)),      # b1
                pl.BlockSpec((H1, H2), lambda i: (0, 0)),     # W2
                pl.BlockSpec((1, H2), lambda i: (0, 0)),      # b2
                pl.BlockSpec((1, H2), lambda i: (0, 0)),      # W3^T row
                pl.BlockSpec((1, 1), lambda i: (0, 0)),       # b3
            ],
            out_specs=[
                pl.BlockSpec((tm, 1), lambda i: (i, 0)),      # out column
                pl.BlockSpec((tm, H2), lambda i: (i, 0)),     # latent z
            ],
        ),
        compiler_params=pltpu.CompilerParams(
            dimension_semantics=("parallel",),
        ),
    )(x, w1, b1, w2, b2, w3t, b3)

    return out, z


# ----------------------------------------------------------------------------
# Pure-JAX reference (for correctness check) and deterministic init.
# ----------------------------------------------------------------------------
def reference_forward(x, params):
    h1 = _leaky_relu(x @ params["w1"] + params["b1"])
    z = _leaky_relu(h1 @ params["w2"] + params["b2"])
    logit = jnp.clip(z @ params["w3"] + params["b3"], -50.0, 50.0)
    out = jnp.maximum(logit, 0.0) + jnp.log1p(jnp.exp(-jnp.abs(logit)))
    return out, z


def init_params(key, size):
    ks = jax.random.split(key, 6)
    return {
        "w1": 0.05 * jax.random.normal(ks[0], (size, 2 * size), jnp.float32),
        "b1": 0.05 * jax.random.normal(ks[1], (2 * size,), jnp.float32),
        "w2": 0.05 * jax.random.normal(ks[2], (2 * size, 256), jnp.float32),
        "b2": 0.05 * jax.random.normal(ks[3], (256,), jnp.float32),
        "w3": 0.05 * jax.random.normal(ks[4], (256, 1), jnp.float32),
        "b3": 0.05 * jax.random.normal(ks[5], (1,), jnp.float32),
    }


# ----------------------------------------------------------------------------
if __name__ == "__main__":
    key = jax.random.PRNGKey(0)
    kparams, kx1, kx2 = jax.random.split(key, 3)

    size = 32   # SugiyamaNet(size=32): fc1 32->64, fc2 64->256, fc_out 256->1
    params = init_params(kparams, size)
    prepared = prepare_params(params)   # hoisted one-time layout prep

    # --- small batch: single tile, latency path -----------------------------
    B = 8
    x = jax.random.normal(kx1, (B, size), jnp.float32)
    out, z = sugiyama_forward(x, prepared)
    jax.block_until_ready((out, z))

    ref_out, ref_z = reference_forward(x, params)
    assert out.shape == (B, 1), out.shape
    assert z.shape == (B, 256), z.shape
    assert bool(jnp.all(jnp.isfinite(out)))
    assert bool(jnp.allclose(out, ref_out, atol=1e-2, rtol=1e-2))
    assert bool(jnp.allclose(z, ref_z, atol=1e-2, rtol=1e-2))

    # --- larger batch: >=2 parallel grid steps + partial edge tile ----------
    B2 = 600
    x2 = jax.random.normal(kx2, (B2, size), jnp.float32)
    out2, z2 = sugiyama_forward(x2, prepared)
    jax.block_until_ready((out2, z2))

    ref_out2, ref_z2 = reference_forward(x2, params)
    assert out2.shape == (B2, 1) and z2.shape == (B2, 256)
    assert bool(jnp.allclose(out2, ref_out2, atol=1e-2, rtol=1e-2))
    assert bool(jnp.allclose(z2, ref_z2, atol=1e-2, rtol=1e-2))

    print("KERNEL_OK")
</pallas_src>

<mosaic_0001>
module attributes {stable_mosaic.version = 11 : i64} {
  func.func @_sugiyama_kernel(%arg0: i32, %arg1: memref<8x32xf32, #tpu.memory_space<vmem>>, %arg2: memref<32x64xf32, #tpu.memory_space<vmem>>, %arg3: memref<1x64xf32, #tpu.memory_space<vmem>>, %arg4: memref<64x256xf32, #tpu.memory_space<vmem>>, %arg5: memref<1x256xf32, #tpu.memory_space<vmem>>, %arg6: memref<1x256xf32, #tpu.memory_space<vmem>>, %arg7: memref<1x1xf32, #tpu.memory_space<vmem>>, %arg8: memref<8x1xf32, #tpu.memory_space<vmem>>, %arg9: memref<8x256xf32, #tpu.memory_space<vmem>>) attributes {dimension_semantics = [#tpu.dimension_semantics<parallel>], iteration_bounds = array<i64: 1>, scalar_prefetch = 0 : i64, scratch_operands = 0 : i64, tpu.core_type = #tpu.core_type<tc>, window_params = [{transform_indices = @transform_0, window_bounds = array<i64: 8, 32>}, {pipeline_mode = #tpu.pipeline_mode<synchronous>, transform_indices = @transform_1, window_bounds = array<i64: 32, 64>}, {pipeline_mode = #tpu.pipeline_mode<synchronous>, transform_indices = @transform_2, window_bounds = array<i64: 1, 64>}, {pipeline_mode = #tpu.pipeline_mode<synchronous>, transform_indices = @transform_3, window_bounds = array<i64: 64, 256>}, {pipeline_mode = #tpu.pipeline_mode<synchronous>, transform_indices = @transform_4, window_bounds = array<i64: 1, 256>}, {pipeline_mode = #tpu.pipeline_mode<synchronous>, transform_indices = @transform_5, window_bounds = array<i64: 1, 256>}, {pipeline_mode = #tpu.pipeline_mode<synchronous>, transform_indices = @transform_6, window_bounds = array<i64: 1, 1>}, {transform_indices = @transform_7, window_bounds = array<i64: 8, 1>}, {transform_indices = @transform_8, window_bounds = array<i64: 8, 256>}]} {
    %c0 = arith.constant 0 : index
    %c0_0 = arith.constant 0 : index
    %0 = vector.load %arg1[%c0, %c0_0] : memref<8x32xf32, #tpu.memory_space<vmem>>, vector<8x32xf32>
    %c0_1 = arith.constant 0 : index
    %c0_2 = arith.constant 0 : index
    %1 = vector.load %arg2[%c0_1, %c0_2] : memref<32x64xf32, #tpu.memory_space<vmem>>, vector<32x64xf32>
    %cst = arith.constant dense<0.000000e+00> : vector<8x64xf32>
    %2 = tpu.matmul %0, %1, %cst {dimension_numbers = #tpu.dot_dimension_numbers<[1], [0], [0], [1], [0, 0, 1, 1], [], []>} : vector<8x32xf32>, vector<32x64xf32>, vector<8x64xf32> -> vector<8x64xf32>
    %c0_3 = arith.constant 0 : index
    %c0_4 = arith.constant 0 : index
    %3 = vector.load %arg3[%c0_3, %c0_4] : memref<1x64xf32, #tpu.memory_space<vmem>>, vector<1x64xf32>
    %4 = vector.broadcast %3 : vector<1x64xf32> to vector<8x64xf32>
    %5 = arith.addf %2, %4 : vector<8x64xf32>
    %cst_5 = arith.constant 0.000000e+00 : f32
    %6 = vector.broadcast %cst_5 : f32 to vector<8x64xf32>
    %7 = arith.cmpf ogt, %5, %6 : vector<8x64xf32>
    %cst_6 = arith.constant 2.000000e-01 : f32
    %8 = vector.broadcast %cst_6 : f32 to vector<8x64xf32>
    %9 = arith.mulf %8, %5 : vector<8x64xf32>
    %10 = arith.select %7, %5, %9 : vector<8x64xi1>, vector<8x64xf32>
    %c0_7 = arith.constant 0 : index
    %c0_8 = arith.constant 0 : index
    %11 = vector.load %arg4[%c0_7, %c0_8] : memref<64x256xf32, #tpu.memory_space<vmem>>, vector<64x256xf32>
    %cst_9 = arith.constant dense<0.000000e+00> : vector<8x256xf32>
    %12 = tpu.matmul %10, %11, %cst_9 {dimension_numbers = #tpu.dot_dimension_numbers<[1], [0], [0], [1], [0, 0, 1, 1], [], []>} : vector<8x64xf32>, vector<64x256xf32>, vector<8x256xf32> -> vector<8x256xf32>
    %c0_10 = arith.constant 0 : index
    %c0_11 = arith.constant 0 : index
    %13 = vector.load %arg5[%c0_10, %c0_11] : memref<1x256xf32, #tpu.memory_space<vmem>>, vector<1x256xf32>
    %14 = vector.broadcast %13 : vector<1x256xf32> to vector<8x256xf32>
    %15 = arith.addf %12, %14 : vector<8x256xf32>
    %cst_12 = arith.constant 0.000000e+00 : f32
    %16 = vector.broadcast %cst_12 : f32 to vector<8x256xf32>
    %17 = arith.cmpf ogt, %15, %16 : vector<8x256xf32>
    %cst_13 = arith.constant 2.000000e-01 : f32
    %18 = vector.broadcast %cst_13 : f32 to vector<8x256xf32>
    %19 = arith.mulf %18, %15 : vector<8x256xf32>
    %20 = arith.select %17, %15, %19 : vector<8x256xi1>, vector<8x256xf32>
    %c0_14 = arith.constant 0 : index
    %c0_15 = arith.constant 0 : index
    %21 = vector.load %arg9[%c0_14, %c0_15] : memref<8x256xf32, #tpu.memory_space<vmem>>, vector<8x256xf32>
    tpu.vector_store %arg9[%c0_14, %c0_15], %20 {strides = array<i32>} : memref<8x256xf32, #tpu.memory_space<vmem>>, vector<8x256xf32>,
    %c0_16 = arith.constant 0 : index
    %c0_17 = arith.constant 0 : index
    %22 = vector.load %arg6[%c0_16, %c0_17] : memref<1x256xf32, #tpu.memory_space<vmem>>, vector<1x256xf32>
    %23 = vector.broadcast %22 : vector<1x256xf32> to vector<8x256xf32>
    %24 = arith.mulf %20, %23 : vector<8x256xf32>
    %cst_18 = arith.constant dense<0.000000e+00> : vector<8xf32>
    %25 = vector.multi_reduction <add>, %24, %cst_18 [1] : vector<8x256xf32> to vector<8xf32>
    %26 = vector.shape_cast %25 : vector<8xf32> to vector<8x1xf32>
    %c0_19 = arith.constant 0 : index
    %c0_20 = arith.constant 0 : index
    %27 = vector.load %arg7[%c0_19, %c0_20] : memref<1x1xf32, #tpu.memory_space<vmem>>, vector<1x1xf32>
    %28 = vector.broadcast %27 : vector<1x1xf32> to vector<8x1xf32>
    %29 = arith.addf %26, %28 : vector<8x1xf32>
    %cst_21 = arith.constant -5.000000e+01 : f32
    %cst_22 = arith.constant 5.000000e+01 : f32
    %30 = vector.broadcast %cst_21 : f32 to vector<8x1xf32>
    %31 = arith.maximumf %30, %29 : vector<8x1xf32>
    %32 = vector.broadcast %cst_22 : f32 to vector<8x1xf32>
    %33 = arith.minimumf %32, %31 : vector<8x1xf32>
    %cst_23 = arith.constant 0.000000e+00 : f32
    %34 = vector.broadcast %cst_23 : f32 to vector<8x1xf32>
    %35 = arith.maximumf %33, %34 : vector<8x1xf32>
    %36 = math.absf %33 : vector<8x1xf32>
    %cst_24 = arith.constant 0.000000e+00 : f32
    %37 = vector.broadcast %cst_24 : f32 to vector<8x1xf32>
    %38 = arith.subf %37, %36 : vector<8x1xf32>
    %39 = math.exp %38 : vector<8x1xf32>
    %40 = math.log1p %39 : vector<8x1xf32>
    %41 = arith.addf %35, %40 : vector<8x1xf32>
    %c0_25 = arith.constant 0 : index
    %c0_26 = arith.constant 0 : index
    %42 = vector.load %arg8[%c0_25, %c0_26] : memref<8x1xf32, #tpu.memory_space<vmem>>, vector<8x1xf32>
    tpu.vector_store %arg8[%c0_25, %c0_26], %41 {strides = array<i32>} : memref<8x1xf32, #tpu.memory_space<vmem>>, vector<8x1xf32>,
    return
  }
  func.func @transform_0(%arg0: i32) -> (i32, i32) {
    %c0_i32 = arith.constant 0 : i32
    %c0_i32_0 = arith.constant 0 : i32
    return %arg0, %c0_i32 : i32, i32
  }
  func.func @transform_1(%arg0: i32) -> (i32, i32) {
    %c0_i32 = arith.constant 0 : i32
    %c0_i32_0 = arith.constant 0 : i32
    %c0_i32_1 = arith.constant 0 : i32
    return %c0_i32, %c0_i32_0 : i32, i32
  }
  func.func @transform_2(%arg0: i32) -> (i32, i32) {
    %c0_i32 = arith.constant 0 : i32
    %c0_i32_0 = arith.constant 0 : i32
    %c0_i32_1 = arith.constant 0 : i32
    return %c0_i32, %c0_i32_0 : i32, i32
  }
  func.func @transform_3(%arg0: i32) -> (i32, i32) {
    %c0_i32 = arith.constant 0 : i32
    %c0_i32_0 = arith.constant 0 : i32
    %c0_i32_1 = arith.constant 0 : i32
    return %c0_i32, %c0_i32_0 : i32, i32
  }
  func.func @transform_4(%arg0: i32) -> (i32, i32) {
    %c0_i32 = arith.constant 0 : i32
    %c0_i32_0 = arith.constant 0 : i32
    %c0_i32_1 = arith.constant 0 : i32
    return %c0_i32, %c0_i32_0 : i32, i32
  }
  func.func @transform_5(%arg0: i32) -> (i32, i32) {
    %c0_i32 = arith.constant 0 : i32
    %c0_i32_0 = arith.constant 0 : i32
    %c0_i32_1 = arith.constant 0 : i32
    return %c0_i32, %c0_i32_0 : i32, i32
  }
  func.func @transform_6(%arg0: i32) -> (i32, i32) {
    %c0_i32 = arith.constant 0 : i32
    %c0_i32_0 = arith.constant 0 : i32
    %c0_i32_1 = arith.constant 0 : i32
    return %c0_i32, %c0_i32_0 : i32, i32
  }
  func.func @transform_7(%arg0: i32) -> (i32, i32) {
    %c0_i32 = arith.constant 0 : i32
    %c0_i32_0 = arith.constant 0 : i32
    return %arg0, %c0_i32 : i32, i32
  }
  func.func @transform_8(%arg0: i32) -> (i32, i32) {
    %c0_i32 = arith.constant 0 : i32
    %c0_i32_0 = arith.constant 0 : i32
    return %arg0, %c0_i32 : i32, i32
  }
}

</mosaic_0001>

<bundles_post_ra>
// kernel: tpu_custom_call.1
= control target key start
LH: loop header
LB: loop body
LE: loop exit
PB: predicated region body
PF: predicated region fallthrough
CT: control target
= control target key end

     0   :  { %s605_s0 = inlined_call_operand.hbm [shape: f32[8,32], index: 0, kind: input, shape index: {}]   ;;  %s606_s1 = inlined_call_operand.hbm [shape: f32[32,64], index: 1, kind: input, shape index: {}]   ;;  %s607_s2 = inlined_call_operand.vmem [shape: f32[1,64], index: 2, kind: input, shape index: {}]   ;;  %s608_s3 = inlined_call_operand.hbm [shape: f32[64,256], index: 3, kind: input, shape index: {}]   ;;  %s609_s4 = inlined_call_operand.vmem [shape: f32[1,256], index: 4, kind: input, shape index: {}]   ;;  %s610_s5 = inlined_call_operand.vmem [shape: f32[1,256], index: 5, kind: input, shape index: {}]   ;;  %s611_s6 = inlined_call_operand.<no memory space> [shape: f32[1,1], index: 6, kind: input, shape index: {}]   ;;  %s612_s7 = inlined_call_operand.vmem [shape: f32[8,1], index: 7, kind: output, shape index: {0}]   ;;  %s613_s8 = inlined_call_operand.hbm [shape: f32[8,256], index: 8, kind: output, shape index: {1}]  }
   0x1   :  { %v14_v0 = vstv %s611_s6 }
   0x2   :  { %15 = vst [vmem:[#allocation2] sm:$0x1] %v14_v0 }
   0x3   :  { %16 = vsyncpa [#allocation4], 0 }
   0x4   :  { %17 = vsyncpa [#allocation7], 0 }
   0x5   :  { %18 = vsyncpa [#allocation5], 0  ;;  %s486_s29 = smov [#allocation6]   ;;  %s392_s11 = scalar_lea.hbm %s606_s1, 512 }
   0x6   :  { %s34_s30 = sshll.u32 %s486_s29, 4  ;;  %p393_p0 = scmp.ne.s32.totalorder %s606_s1, %s392_s11  ;;  %s35_s30 = int_to_ptr.vmem [resolvable:$true] %s34_s30 }
   0x7   :  { %p396_p1 = scmp.lt.u32.totalorder %s392_s11, %s606_s1 }
   0x9   :  { %p398_p2 = pnand %p396_p1, %p393_p0 }
   0xb   :  { %401 = shalt.err (!%p398_p2)
}
   0xc   :  { %s402_s6 = scalar_lea.vmem %s35_s30, 512  ;;  %p407_p4 = scmp.lt.s32.totalorder %s35_s30, %s35_s30 }
   0xd   :  { %p403_p3 = scmp.ne.s32.totalorder %s35_s30, %s402_s6  ;;  %p408_p5 = scmp.lt.s32.totalorder %s402_s6, %s402_s6 }
   0xf   :  { %p409_p6 = por %p408_p5, %p407_p4 }
  0x11   :  { %p410_p7 = pnand %p409_p6, %p403_p3 }
  0x13   :  { %413 = shalt.err (!%p410_p7)
}
  0x14   :  { %s487_s16 = smov 128   ;;  %s488_s17 = smov 8  }
  0x15   :  { %40 = dma.hbm_to_vmem [thread:$0]  %s606_s1, 512, %s35_s30, [#allocation7], %s487_s16, %s487_s16, %s488_s17  }
  0x16   :  { %s489_s20 = smov [#allocation3]   ;;  %s490_s22 = smov [#allocation8]  }
  0x17   :  { %s25_s21 = sshll.u32 %s489_s20, 4  ;;  %s48_s23 = sshll.u32 %s490_s22, 4  ;;  %s26_s21 = int_to_ptr.vmem [resolvable:$true] %s25_s21  ;;  %s49_s23 = int_to_ptr.vmem [resolvable:$true] %s48_s23 }
  0x18   :  { %s414_s26 = scalar_lea.hbm %s605_s0, 128 }
  0x19   :  { %p415_p8 = scmp.ne.s32.totalorder %s605_s0, %s414_s26  ;;  %p418_p9 = scmp.lt.u32.totalorder %s414_s26, %s605_s0 }
  0x1b   :  { %p420_p10 = pnand %p418_p9, %p415_p8 }
  0x1d   :  { %423 = shalt.err (!%p420_p10)
}
  0x1e   :  { %s424_s1 = scalar_lea.vmem %s26_s21, 128  ;;  %p429_p12 = scmp.lt.s32.totalorder %s26_s21, %s26_s21 }
  0x1f   :  { %p425_p11 = scmp.ne.s32.totalorder %s26_s21, %s424_s1  ;;  %p430_p13 = scmp.lt.s32.totalorder %s424_s1, %s424_s1 }
  0x21   :  { %p431_p0 = por %p430_p13, %p429_p12 }
  0x23   :  { %p432_p1 = pnand %p431_p0, %p425_p11 }
  0x25   :  { %435 = shalt.err (!%p432_p1)
}
  0x26   :  { %28 = dma.hbm_to_vmem [thread:$0]  %s605_s0, 128, %s26_s21, [#allocation4]  }
  0x27   :  { %s436_s13 = scalar_lea.hbm %s608_s3, 2048 }
  0x28   :  { %p437_p2 = scmp.ne.s32.totalorder %s608_s3, %s436_s13  ;;  %p440_p3 = scmp.lt.u32.totalorder %s436_s13, %s608_s3 }
  0x2a   :  { %p442_p4 = pnand %p440_p3, %p437_p2 }
  0x2c   :  { %445 = shalt.err (!%p442_p4)
}
  0x2d   :  { %s446_s17 = scalar_lea.vmem %s49_s23, 2048  ;;  %p451_p6 = scmp.lt.s32.totalorder %s49_s23, %s49_s23 }
  0x2e   :  { %p447_p5 = scmp.ne.s32.totalorder %s49_s23, %s446_s17  ;;  %p452_p7 = scmp.lt.s32.totalorder %s446_s17, %s446_s17 }
  0x30   :  { %p453_p8 = por %p452_p7, %p451_p6 }
  0x32   :  { %p454_p9 = pnand %p453_p8, %p447_p5 }
  0x34   :  { %457 = shalt.err (!%p454_p9)
}
  0x35   :  { %s491_s0 = smov 256   ;;  %s492_s18 = smov 16  }
  0x36   :  { %54 = dma.hbm_to_vmem [thread:$0]  %s608_s3, 2048, %s49_s23, [#allocation7], %s491_s0, %s491_s0, %s492_s18  }
  0x37   :  { %480 = dma.done.wait [#allocation4], 128  }
  0x38   :  { %481 = vsyncadd [#allocation4], 4294967168 }
  0x39   :  { %482 = dma.done.wait [#allocation7], 2560  }
  0x3a   :  { %483 = vsyncadd [#allocation7], 4294964736  ;;  %v493_v1 = vmov 0.0|0.0   ;;  %vm494_vm0 = vmmov 0   ;;  %v495_v2 = vmov 0.0   ;;  %v71_v3 = vld [vmem:[#allocation6] sm:$0xff]  ;;  %v177_v40 = vlaneseq }
  0x3b   :  { %355 = vmatprep.subr.bf16.mxu0 %v493_v1  ;;  %352 = vmatprep.mubr.msk.f32.mxu0 %vm494_vm0, %v495_v2  ;;  %v72_v4 = vld [vmem:[#allocation6 + $0x8] sm:$0xff]  ;;  %v73_v5 = vld [vmem:[#allocation6 + $0x10] sm:$0xff]  ;;  %v74_v7 = vld [vmem:[#allocation6 + $0x18] sm:$0xff]  ;;  %vm82_vm1 = vcmask 261120   ;;  %vm187_vm3 = vcmask 523264  }
  0x3c   :  { %255 = vmatprep.mubr.f32.mxu1 %v495_v2  ;;  %v356_v6 = vpack.c.bf16 %v72_v4, %v71_v3  ;;  %v160_v8 = vld [vmem:[#allocation8 + $0x8] sm:$0xff]  ;;  %v162_v9 = vld [vmem:[#allocation8 + $0x18] sm:$0xff]  ;;  %v159_v10 = vld [vmem:[#allocation8] sm:$0xff]  ;;  %v359_v12 = vpack.c.bf16 %v74_v7, %v73_v5  ;;  %v178_v41 = vshrl.u32 %v177_v40, 7 }
  0x3d   :  { %v161_v11 = vld [vmem:[#allocation8 + $0x10] sm:$0xff]  ;;  %v361_v13 = vpack.c.bf16 %v162_v9, %v160_v8  ;;  %v164_v15 = vld [vmem:[#allocation8 + $0x28] sm:$0xff]  ;;  %v166_v16 = vld [vmem:[#allocation8 + $0x38] sm:$0xff] }
  0x3e   :  { %357 = vmatpush3.bf16.msra.mxu0 %v356_v6  ;;  %v363_v14 = vpack.c.bf16 %v161_v11, %v159_v10  ;;  %v163_v17 = vld [vmem:[#allocation8 + $0x20] sm:$0xff]  ;;  %v365_v18 = vpack.c.bf16 %v166_v16, %v164_v15  ;;  %v165_v19 = vld [vmem:[#allocation8 + $0x30] sm:$0xff]  ;;  %v168_v20 = vld [vmem:[#allocation8 + $0x48] sm:$0xff]  ;;  %v179_v42 = vsub.s32 0, %v178_v41  ;;  %v183_v44 = vsub.s32 1, %v178_v41 }
  0x3f   :  { %358 = vmatprep.subr.bf16.mxu0 %v493_v1  ;;  %v170_v21 = vld [vmem:[#allocation8 + $0x58] sm:$0xff]  ;;  %362 = vmatprep.subr.bf16.mxu1 %v361_v13  ;;  %v367_v22 = vpack.c.bf16 %v165_v19, %v163_v17  ;;  %v167_v25 = vld [vmem:[#allocation8 + $0x40] sm:$0xff]  ;;  %v169_v26 = vld [vmem:[#allocation8 + $0x50] sm:$0xff] }
  0x40   :  { %364 = vmatpush1.bf16.msra.mxu1 %v363_v14  ;;  %v70_v23 = vld [vmem:[#allocation3] sm:$0xff]  ;;  %v369_v24 = vpack.c.bf16 %v170_v21, %v168_v20  ;;  %v371_v27 = vpack.c.bf16 %v169_v26, %v167_v25  ;;  %v172_v28 = vld [vmem:[#allocation8 + $0x68] sm:$0xff]  ;;  %v171_v31 = vld [vmem:[#allocation8 + $0x60] sm:$0xff] }
  0x41   :  { %366 = vmatprep.subr.bf16.mxu1 %v365_v18  ;;  %v174_v29 = vld [vmem:[#allocation8 + $0x78] sm:$0xff]  ;;  %v173_v32 = vld [vmem:[#allocation8 + $0x70] sm:$0xff] }
  0x42   :  { %360 = vmatpush3.bf16.msra.mxu0 %v359_v12  ;;  %v373_v30 = vpack.c.bf16 %v174_v29, %v172_v28  ;;  %v375_v33 = vpack.c.bf16 %v173_v32, %v171_v31  ;;  %v334_v34 = vld [vmem:[%s607_s2] ss:$0 sm:$0xff] }
  0x43   :  { %v175_v43 = vld [vmem:[%s609_s4] sm:$0x3]  ;;  %s496_s4 = smov [#allocation9]  }
  0x44   :  { %368 = vmatpush1.bf16.msra.mxu1 %v367_v22  ;;  %v180_v45 = vrot.slane %v175_v43, %v179_v42  ;;  %v184_v46 = vrot.slane %v175_v43, %v183_v44  ;;  %v270_v47 = vld [vmem:[%s610_s5] sm:$0x3]  ;;  %s322_s5 = sshll.u32 %s496_s4, 4  ;;  %s323_s5 = int_to_ptr.vmem [resolvable:$true] %s322_s5 }
  0x45   :  { %353 = vmatmul.mubr.msk.f32.vlgmr.msra.gmra.mrb[0].mxu0 %vm82_vm1, %v70_v23  ;;  %370 = vmatprep.subr.bf16.mxu1 %v369_v24  ;;  %v275_v52 = vrot.slane %v270_v47, %v179_v42  ;;  %v279_v54 = vrot.slane %v270_v47, %v183_v44  ;;  %s458_s25 = scalar_lea.vmem %s323_s5, 256  ;;  %p463_p11 = scmp.lt.s32.totalorder %s323_s5, %s323_s5 }
  0x46   :  { %p459_p10 = scmp.ne.s32.totalorder %s323_s5, %s458_s25  ;;  %p464_p12 = scmp.lt.s32.totalorder %s458_s25, %s458_s25 }
  0x48   :  { %372 = vmatpush1.bf16.msra.mxu1 %v371_v27  ;;  %p465_p13 = por %p464_p12, %p463_p11 }
  0x49   :  { %374 = vmatprep.subr.bf16.mxu1 %v373_v30 }
  0x4a   :  { %p466_p0 = pnand %p465_p13, %p459_p10 }
  0x4c   :  { %376 = vmatpush1.bf16.msra.mxu1 %v375_v33 }
 0x118   :  { %v152_v35 = vpop.f32.mrb[0].mxu0 }
 0x119   :  { %v153_v36 = vadd.f32 %v334_v34, %v152_v35  ;;  %v354_v37 = vpop.f32.mrb[1].mxu0 }
 0x11b   :  { %vm156_vm2 = vcmp.gt.f32.partialorder %v153_v36, 0.0  ;;  %v157_v38 = vmul.f32 0.2, %v153_v36 }
 0x11d   :  { %v158_v39 = vsel %vm156_vm2, %v153_v36, %v157_v38 }
 0x11e   :  { %336 = vmatmul.mubr.msk.f32.vlgmr.msra.gmra.mrb[0].mxu1 %vm187_vm3, %v158_v39 }
 0x1f1   :  { %v257_v48 = vpop.f32.mrb[0].mxu1 }
 0x1f2   :  { %v258_v49 = vadd.f32 %v257_v48, %v180_v45  ;;  %v259_v50 = vpop.f32.mrb[1].mxu1 }
 0x1f3   :  { %v260_v51 = vadd.f32 %v259_v50, %v184_v46 }
 0x1f4   :  { %vm262_vm4 = vcmp.gt.f32.partialorder %v258_v49, 0.0  ;;  %v264_v53 = vmul.f32 0.2, %v258_v49 }
 0x1f5   :  { %vm263_vm5 = vcmp.gt.f32.partialorder %v260_v51, 0.0  ;;  %v265_v55 = vmul.f32 0.2, %v260_v51 }
 0x1f6   :  { %v266_v56 = vsel %vm262_vm4, %v258_v49, %v264_v53 }
 0x1f7   :  { %v267_v57 = vsel %vm263_vm5, %v260_v51, %v265_v55  ;;  %v282_v58 = vmul.f32 %v275_v52, %v266_v56  ;;  %268 = vst [vmem:[#allocation9] sm:$0xff] %v266_v56 }
 0x1f8   :  { %v283_v59 = vmul.f32 %v279_v54, %v267_v57  ;;  %269 = vst [vmem:[#allocation9 + $0x8] sm:$0xff] %v267_v57 }
 0x1fa   :  { %v284_v60 = vadd.f32 %v283_v59, %v282_v58 }
 0x1fc   :  { %285 = vadd.xlane.f32.xlu0 %v284_v60 }
 0x1fd   :  { %469 = shalt.err (!%p466_p0)
}
 0x1fe   :  { %s470_s28 = scalar_lea.hbm %s613_s8, 256 }
 0x1ff   :  { %p471_p1 = scmp.ne.s32.totalorder %s613_s8, %s470_s28  ;;  %p474_p2 = scmp.lt.u32.totalorder %s470_s28, %s613_s8 }
 0x201   :  { %p476_p3 = pnand %p474_p2, %p471_p1 }
 0x203   :  { %479 = shalt.err (!%p476_p3)
}
 0x204   :  { %325 = dma.vmem_to_hbm [thread:$0]  %s323_s5, 256, %s613_s8, [#allocation5]   ;;  %v337_v61 = vld [vmem:[#allocation2] ss:$0 sm:$0xff]  ;;  %vm312_vm7 = vcmask 7168  }
 0x289   :  { %v286_v62 = vpop.xlane.xlu0 %285 }
 0x28a   :  { %v294_v63 = vadd.f32 %v337_v61, %v286_v62 }
 0x28c   :  { %v338_v0 = vclamps-f32 %v294_v63, 50.0 }
 0x28e   :  { %v298_v1 = vand.u32 2147483647, %v338_v0  ;;  %v297_v12 = vmax.f32 %v338_v0, 0.0 }
 0x290   :  { %v299_v2 = vsub.f32 0.0, %v298_v1 }
 0x292   :  { %v300_v3 = vmul.f32 1.442695, %v299_v2 }
 0x294   :  { %388 = vpow2.f32 %v300_v3 }
 0x29e   :  { %v389_v4 = vpop.eup %388 }
 0x29f   :  { %v302_v5 = vadd.f32 1.0, %v389_v4  ;;  %v305_v6 = vmul.f32 -0.5, %v389_v4  ;;  %v308_v8 = vand.u32 2147483647, %v389_v4 }
 0x2a1   :  { %390 = vlog2.f32 %v302_v5  ;;  %v306_v7 = vadd.f32 1.0, %v305_v6  ;;  %vm309_vm6 = vcmp.lt.f32.partialorder %v308_v8, 0.0004427343 }
 0x2a3   :  { %v307_v11 = vmul.f32 %v389_v4, %v306_v7 }
 0x2ab   :  { %v391_v9 = vpop.eup %390 }
 0x2ac   :  { %v304_v10 = vmul.f32 0.6931472, %v391_v9 }
 0x2ae   :  { %v310_v13 = vsel %vm309_vm6, %v307_v11, %v304_v10 }
 0x2af   :  { %v311_v14 = vadd.f32 %v310_v13, %v297_v12 }
 0x2b1   :  { %313 = vst.msk [vmem:[%s612_s7] sm:$0xff] %vm312_vm7, %v311_v14 }
 0x2b2   :  { %484 = dma.done.wait [#allocation5], 256  }
 0x2b3   :  { %485 = vsyncadd [#allocation5], 4294967040 }
 0x2b4   :  { %331 = vsyncpa [#allocation4], 1 }
 0x2b5   :  { %332 = vsyncpa [#allocation7], 1 }
 0x2b6   :  { %333 = vsyncpa [#allocation5], 1 }

</bundles_post_ra>
